<compile_context>
chip_gen: v6e
topology: v6e:2x2x1
jax: 0.10.0
libtpu: 0.0.40
codegen_flags: <defaults>
</compile_context>

<pallas_src>
import functools

import numpy as np
import jax
import jax.numpy as jnp
from jax.experimental import pallas as pl
from jax.experimental.pallas import tpu as pltpu


_DN_OUTER = (((0,), (0,)), ((), ()))   # contract over axis 0 of both operands


def _round_up(x, m):
    return ((x + m - 1) // m) * m


def _vmem_budget_and_limit():
    """Generation-aware working-set budget and scoped-VMEM limit (bytes)."""
    try:
        phys = int(pltpu.get_tpu_info().vmem_capacity_bytes)
    except Exception:
        phys = 64 * 1024 * 1024        # conservative: v7x has 64 MiB per TC
    budget = (phys * 3) // 4           # e.g. 96 MiB on v5e/v6e, 48 MiB on v7x
    limit = min(phys - (8 << 20), budget + (16 << 20))
    limit = max(limit, budget)
    return budget, int(limit)


def _choose_tile_n(n_per_split, d, c, x_bytes, vmem_budget):
    # Resident accumulator blocks (x2: the pipeline may double-buffer them).
    out_bytes = 2 * (2 * d * d + _round_up(c, 8) * d) * 4
    # Per streamed row: double-buffered X row + lane-padded (TN,1) int32 label
    # row (it occupies a full 128-lane row in VMEM -> 512 B per row per buffer).
    per_row = 2 * (d * x_bytes + 512)
    avail = vmem_budget - out_bytes - (1 << 20)      # 1 MiB slack (inv/shift)
    if avail <= per_row * 256:
        # TODO(synk): switch to the D-tiled variant instead of shrinking TN
        # when the (D,D) accumulators alone approach the VMEM budget.
        rows = 256
    else:
        rows = avail // per_row
    tile = int(min(rows, 4096, _round_up(n_per_split, 8)))
    if tile >= 256:
        tile = (tile // 256) * 256     # full MXU contraction depth
    tile = max(8, (tile // 8) * 8)
    return tile


# -----------------------------------------------------------------------------
# Kernel: streaming shift-centered scatter accumulation over N.
# -----------------------------------------------------------------------------
def _scatter_kernel(inv_ref, shift_ref, y_ref, x_ref,
                    csum_ref, xtx_ref, wxtx_ref, *, n_classes):
    @pl.when(pl.program_id(1) == 0)
    def _init():
        csum_ref[...] = jnp.zeros_like(csum_ref)
        xtx_ref[...] = jnp.zeros_like(xtx_ref)
        wxtx_ref[...] = jnp.zeros_like(wxtx_ref)

    x = x_ref[...]                                   # (TN, D) f32 or bf16
    z = x - shift_ref[...]                           # shift-centered rows
    y = y_ref[...]                                   # (TN, 1) int32
    tn = z.shape[0]

    # One-hot built in-kernel; padded rows carry label == n_classes -> all-zero
    # row -> zero contribution to every accumulator (padded X rows == shift,
    # so z == 0 there as well).  No ragged-tile mask needed.
    classes = jax.lax.broadcasted_iota(jnp.int32, (tn, n_classes), 1)
    oh = (y == classes).astype(jnp.float32)          # (TN, C)

    # Per-sample weight s_i = 1/(N_{y_i} - 1) on the VPU/XLU (no 1-lane matmul).
    s = jnp.sum(oh * inv_ref[...], axis=1, keepdims=True)   # (TN, 1) f32

    mm = z.dtype
    oh_mm = oh.astype(mm)
    zs = z * s.astype(mm)

    # Accumulate directly into the resident output blocks (f32 accumulation).
    xtx_ref[...] += jax.lax.dot_general(             # sum z z^T
        z, z, _DN_OUTER, preferred_element_type=jnp.float32)
    wxtx_ref[...] += jax.lax.dot_general(            # sum s_i z z^T
        zs, z, _DN_OUTER, preferred_element_type=jnp.float32)
    csum_ref[...] += jax.lax.dot_general(            # per-class sums of z
        oh_mm, z, _DN_OUTER, preferred_element_type=jnp.float32)


def _lda_partial_sums(Xf, y, counts, shift, *, n_classes, tile_n=None,
                      mxu_bf16=False, num_splits=None):
    n, d = Xf.shape
    c = int(n_classes)
    in_dtype = jnp.bfloat16 if mxu_bf16 else jnp.float32
    x_bytes = jnp.dtype(in_dtype).itemsize

    budget, vmem_limit = _vmem_budget_and_limit()

    if num_splits is None:
        # Leading "parallel" axis: v7x's 2 TensorCores each stream half of N
        # into private partials; near-free on single-TC chips.
        num_splits = 2 if n >= 4096 else 1
    num_splits = max(1, int(num_splits))

    n_per_split = pl.cdiv(n, num_splits)
    if tile_n is None:
        tile_n = _choose_tile_n(n_per_split, d, c, x_bytes, budget)
    tile_n = max(8, (int(tile_n) // 8) * 8)

    steps = pl.cdiv(n_per_split, tile_n)
    n_pad = num_splits * steps * tile_n

    x_in = Xf.astype(in_dtype)
    shift_in = shift.astype(in_dtype)                # (1, D)
    y_in = jnp.asarray(y, jnp.int32).reshape(n, 1)

    pad = n_pad - n
    if pad:
        # Pad rows with X == shift (z == 0) and label == C (one-hot == 0).
        x_in = jnp.concatenate(
            [x_in, jnp.broadcast_to(shift_in, (pad, d))], axis=0)
        y_in = jnp.concatenate(
            [y_in, jnp.full((pad, 1), c, jnp.int32)], axis=0)

    # Note: a class with exactly 1 sample yields inf here, matching the
    # reference's division by (Nc - 1); use LDA.forward(validate=True).
    inv_cm1 = (1.0 / (counts.astype(jnp.float32) - 1.0)).reshape(1, c)

    kernel = functools.partial(_scatter_kernel, n_classes=c)
    row_map = lambda s, i: (s * steps + i, 0)
    out_map = lambda s, i: (s, 0, 0)

    csum_p, xtx_p, wxtx_p = pl.pallas_call(
        kernel,
        grid=(num_splits, steps),
        in_specs=[pl.BlockSpec((1, c), lambda s, i: (0, 0)),
                  pl.BlockSpec((1, d), lambda s, i: (0, 0)),
                  pl.BlockSpec((tile_n, 1), row_map),
                  pl.BlockSpec((tile_n, d), row_map)],
        out_specs=[pl.BlockSpec((None, c, d), out_map),
                   pl.BlockSpec((None, d, d), out_map),
                   pl.BlockSpec((None, d, d), out_map)],
        out_shape=[jax.ShapeDtypeStruct((num_splits, c, d), jnp.float32),
                   jax.ShapeDtypeStruct((num_splits, d, d), jnp.float32),
                   jax.ShapeDtypeStruct((num_splits, d, d), jnp.float32)],
        compiler_params=pltpu.CompilerParams(
            dimension_semantics=("parallel", "arbitrary"),
            vmem_limit_bytes=int(vmem_limit)),
    )(inv_cm1, shift_in, y_in, x_in)

    return csum_p.sum(axis=0), xtx_p.sum(axis=0), wxtx_p.sum(axis=0)


def lda_scatter(Xf, y, counts, *, n_classes, lamb, tile_n=None,
                mxu_bf16=False, num_splits=None):
    """Returns (Xc_mean (C,D), Sw (D,D), Sb (D,D)) matching the PyTorch lda()."""
    Xf = jnp.asarray(Xf, jnp.float32)
    n, d = Xf.shape
    counts = jnp.asarray(counts, jnp.float32).reshape(-1)

    # Cheap approximate per-feature mean (prefix of X), quantized to the MXU
    # input dtype so kernel and finalize use the exact same shift.
    in_dtype = jnp.bfloat16 if mxu_bf16 else jnp.float32
    shift = jnp.mean(Xf[: min(n, 4096)], axis=0, keepdims=True)
    shift = shift.astype(in_dtype).astype(jnp.float32)           # (1, D)

    csum, xtx, wxtx = _lda_partial_sums(
        Xf, y, counts, shift, n_classes=n_classes, tile_n=tile_n,
        mxu_bf16=mxu_bf16, num_splits=num_splits)

    # Finalize (tiny D x D algebra) in plain XLA.  With z = x - shift:
    #   St = (sum z z^T - (sum z)(sum z)^T / N) / (N - 1)
    #   Sw = (sum s_i z z^T - sum_c Nc/(Nc-1) mz_c mz_c^T) / n_classes
    #   Sb = St - Sw ; Sw += lamb * I          (same ordering as the reference)
    counts_col = counts.reshape(-1, 1)
    xc_mean_z = csum / counts_col                                # (C, D)
    total_z = jnp.sum(csum, axis=0, keepdims=True)               # (1, D)
    nf = float(n)
    st = (xtx - (total_z.T @ total_z) / nf) / (nf - 1.0)
    w = counts_col / (counts_col - 1.0)                          # (C, 1)
    corr = (xc_mean_z * w).T @ xc_mean_z
    sw = (wxtx - corr) / float(n_classes)
    sb = st - sw
    sw = sw + float(lamb) * jnp.eye(d, dtype=jnp.float32)
    xc_mean = xc_mean_z + shift
    return xc_mean, sw, sb


# -----------------------------------------------------------------------------
# LDA module (JAX / Pallas version of the PyTorch module)
# -----------------------------------------------------------------------------
class LDA:
    def __init__(self, n_classes, lamb, mxu_bf16=False):
        self.n_classes = n_classes
        self.n_components = n_classes - 1
        self.lamb = lamb
        self.mxu_bf16 = mxu_bf16   # opt-in bf16 streaming (f32 accumulation)

    def forward(self, X, y, validate=False, tile_n=None, num_splits=None):
        n_classes = self.n_classes
        X = jnp.asarray(X, jnp.float32)
        Xf = X.reshape(X.shape[0], -1)                            # (N, D)
        y = jnp.asarray(y, jnp.int32)

        counts = jnp.bincount(y, length=n_classes).astype(jnp.float32)
        if validate:
            # Opt-in: forces a device->host sync, so off the hot path.
            assert int(jnp.min(counts)) > 1, "each class needs >= 2 samples"

        Xc_mean, Sw, Sb = lda_scatter(
            Xf, y, counts, n_classes=n_classes, lamb=self.lamb,
            tile_n=tile_n, mxu_bf16=self.mxu_bf16, num_splits=num_splits)

        # TODO(synk): torch.pinverse + torch.eig (general non-symmetric eig)
        # have no Pallas/TPU lowering; computed on host with NumPy.
        Sw_h = np.asarray(Sw, dtype=np.float64)
        Sb_h = np.asarray(Sb, dtype=np.float64)
        temp = np.linalg.pinv(Sw_h) @ Sb_h
        w, v = np.linalg.eig(temp)
        noncomplex_idx = w.imag == 0
        evals = np.real(w)[noncomplex_idx]
        evecs = np.real(v[:, noncomplex_idx])
        inc_idx = np.argsort(evals)
        evals = evals[inc_idx]
        evecs = evecs[:, inc_idx]
        hasComplexEVal = evecs.shape[1] < evecs.shape[0]

        self.scalings_ = jnp.asarray(evecs, dtype=jnp.float32)    # (D, K)
        # coef_/intercept_ are tiny (C~4, K~3) -> plain XLA, no pallas_call.
        proj = Xc_mean @ self.scalings_                           # (C, K)
        coef = proj @ self.scalings_.T                            # (C, D)
        self.coef_ = coef
        self.intercept_ = -0.5 * jnp.sum(Xc_mean * coef, axis=1)  # (C,)
        self.Xc_mean_ = Xc_mean

        return hasComplexEVal, jnp.asarray(evals, dtype=jnp.float32)

    def transform(self, X):
        X_new = jnp.asarray(X, jnp.float32) @ self.scalings_
        return X_new[:, :self.n_components]

    def predict(self, X):
        logit = jnp.asarray(X, jnp.float32) @ self.coef_.T + self.intercept_
        return jnp.argmax(logit, axis=1)

    def predict_proba(self, X):
        logit = jnp.asarray(X, jnp.float32) @ self.coef_.T + self.intercept_
        return jax.nn.softmax(logit, axis=1)

    def predict_log_proba(self, X):
        logit = jnp.asarray(X, jnp.float32) @ self.coef_.T + self.intercept_
        return jax.nn.log_softmax(logit, axis=1)


# -----------------------------------------------------------------------------
# Pure-JAX reference (mirrors the PyTorch loop) for a light sanity check.
# -----------------------------------------------------------------------------
def _reference_scatter(Xf, y, n_classes, lamb):
    n, d = Xf.shape
    mean = jnp.mean(Xf, axis=0, keepdims=True)
    xb = Xf - mean
    st = xb.T @ xb / (n - 1)
    sw = jnp.zeros((d, d), jnp.float32)
    xc_mean = jnp.zeros((n_classes, d), jnp.float32)
    for c in range(n_classes):
        mask = (y == c).astype(jnp.float32)[:, None]
        nc = jnp.sum(mask)
        m_c = jnp.sum(Xf * mask, axis=0) / nc
        xc_b = (Xf - m_c) * mask
        sw = sw + xc_b.T @ xc_b / (nc - 1.0)
        xc_mean = xc_mean.at[c].set(m_c)
    sw = sw / n_classes
    sb = st - sw
    sw = sw + jnp.eye(d, dtype=jnp.float32) * lamb
    return xc_mean, sw, sb


if __name__ == "__main__":
    key = jax.random.PRNGKey(0)
    kx, ky = jax.random.split(key)

    n_classes = 4
    lamb = 1e-3
    N = 200                            # 50 samples / class, D = 4 * 8 = 32
    # NCHW-style batch flattened to (N, D=32); +3 offset exercises the shift.
    X = jax.random.normal(kx, (N, 4, 8), dtype=jnp.float32) + 3.0
    y = jax.random.permutation(
        ky, jnp.arange(N, dtype=jnp.int32) % n_classes)

    model = LDA(n_classes, lamb)
    # tile_n=64 + num_splits=2 exercises the streaming path with padding and
    # the per-core partial accumulators.
    hasComplexEVal, evals = model.forward(X, y, tile_n=64, num_splits=2)
    jax.block_until_ready((model.coef_, model.intercept_,
                           model.scalings_, model.Xc_mean_, evals))

    # Light numerical sanity check of the Pallas scatter kernel vs pure JAX,
    # for both the split (v7x-style) and the single-partial path.
    Xf = X.reshape(N, -1)
    counts = jnp.bincount(y, length=n_classes).astype(jnp.float32)
    Xc_ref, Sw_ref, Sb_ref = _reference_scatter(Xf, y, n_classes, lamb)
    for ns in (2, 1):
        Xc_mean, Sw, Sb = lda_scatter(Xf, y, counts, n_classes=n_classes,
                                      lamb=lamb, tile_n=64, num_splits=ns)
        np.testing.assert_allclose(np.asarray(Xc_mean), np.asarray(Xc_ref),
                                   rtol=5e-3, atol=5e-3)
        np.testing.assert_allclose(np.asarray(Sw), np.asarray(Sw_ref),
                                   rtol=5e-3, atol=5e-3)
        np.testing.assert_allclose(np.asarray(Sb), np.asarray(Sb_ref),
                                   rtol=5e-3, atol=5e-3)

    print("KERNEL_OK")
</pallas_src>

<mosaic_0001>
module attributes {stable_mosaic.version = 11 : i64} {
  func.func @_scatter_kernel(%arg0: i32, %arg1: i32, %arg2: memref<1x4xf32, #tpu.memory_space<vmem>>, %arg3: memref<1x32xf32, #tpu.memory_space<vmem>>, %arg4: memref<64x1xi32, #tpu.memory_space<vmem>>, %arg5: memref<64x32xf32, #tpu.memory_space<vmem>>, %arg6: memref<1x4x32xf32, #tpu.memory_space<vmem>>, %arg7: memref<1x32x32xf32, #tpu.memory_space<vmem>>, %arg8: memref<1x32x32xf32, #tpu.memory_space<vmem>>) attributes {dimension_semantics = [#tpu.dimension_semantics<parallel>, #tpu.dimension_semantics<arbitrary>], iteration_bounds = array<i64: 2, 2>, scalar_prefetch = 0 : i64, scratch_operands = 0 : i64, tpu.core_type = #tpu.core_type<tc>, window_params = [{pipeline_mode = #tpu.pipeline_mode<synchronous>, transform_indices = @transform_0, window_bounds = array<i64: 1, 4>}, {pipeline_mode = #tpu.pipeline_mode<synchronous>, transform_indices = @transform_1, window_bounds = array<i64: 1, 32>}, {transform_indices = @transform_2, window_bounds = array<i64: 64, 1>}, {transform_indices = @transform_3, window_bounds = array<i64: 64, 32>}, {transform_indices = @transform_4, window_bounds = array<i64: 1, 4, 32>}, {transform_indices = @transform_5, window_bounds = array<i64: 1, 32, 32>}, {transform_indices = @transform_6, window_bounds = array<i64: 1, 32, 32>}]} {
    %c0_i32 = arith.constant 0 : i32
    %0 = arith.cmpi eq, %arg1, %c0_i32 : i32
    %1 = arith.extui %0 : i1 to i32
    %c0_i32_0 = arith.constant 0 : i32
    %2 = arith.cmpi ne, %1, %c0_i32_0 : i32
    scf.if %2 {
      %cst_29 = arith.constant 0.000000e+00 : f32
      %41 = vector.broadcast %cst_29 : f32 to vector<4x32xf32>
      %c0_30 = arith.constant 0 : index
      %c0_31 = arith.constant 0 : index
      %c0_32 = arith.constant 0 : index
      %42 = vector.load %arg6[%c0_30, %c0_31, %c0_32] : memref<1x4x32xf32, #tpu.memory_space<vmem>>, vector<1x4x32xf32>
      %43 = vector.shape_cast %42 : vector<1x4x32xf32> to vector<4x32xf32>
      %44 = vector.shape_cast %41 : vector<4x32xf32> to vector<1x4x32xf32>
      tpu.vector_store %arg6[%c0_30, %c0_31, %c0_32], %44 {strides = array<i32>} : memref<1x4x32xf32, #tpu.memory_space<vmem>>, vector<1x4x32xf32>,
      %cst_33 = arith.constant 0.000000e+00 : f32
      %45 = vector.broadcast %cst_33 : f32 to vector<32x32xf32>
      %c0_34 = arith.constant 0 : index
      %c0_35 = arith.constant 0 : index
      %c0_36 = arith.constant 0 : index
      %46 = vector.load %arg7[%c0_34, %c0_35, %c0_36] : memref<1x32x32xf32, #tpu.memory_space<vmem>>, vector<1x32x32xf32>
      %47 = vector.shape_cast %46 : vector<1x32x32xf32> to vector<32x32xf32>
      %48 = vector.shape_cast %45 : vector<32x32xf32> to vector<1x32x32xf32>
      tpu.vector_store %arg7[%c0_34, %c0_35, %c0_36], %48 {strides = array<i32>} : memref<1x32x32xf32, #tpu.memory_space<vmem>>, vector<1x32x32xf32>,
      %cst_37 = arith.constant 0.000000e+00 : f32
      %49 = vector.broadcast %cst_37 : f32 to vector<32x32xf32>
      %c0_38 = arith.constant 0 : index
      %c0_39 = arith.constant 0 : index
      %c0_40 = arith.constant 0 : index
      %50 = vector.load %arg8[%c0_38, %c0_39, %c0_40] : memref<1x32x32xf32, #tpu.memory_space<vmem>>, vector<1x32x32xf32>
      %51 = vector.shape_cast %50 : vector<1x32x32xf32> to vector<32x32xf32>
      %52 = vector.shape_cast %49 : vector<32x32xf32> to vector<1x32x32xf32>
      tpu.vector_store %arg8[%c0_38, %c0_39, %c0_40], %52 {strides = array<i32>} : memref<1x32x32xf32, #tpu.memory_space<vmem>>, vector<1x32x32xf32>,
    } else {
    }
    %c0 = arith.constant 0 : index
    %c0_1 = arith.constant 0 : index
    %3 = vector.load %arg5[%c0, %c0_1] : memref<64x32xf32, #tpu.memory_space<vmem>>, vector<64x32xf32>
    %c0_2 = arith.constant 0 : index
    %c0_3 = arith.constant 0 : index
    %4 = vector.load %arg3[%c0_2, %c0_3] : memref<1x32xf32, #tpu.memory_space<vmem>>, vector<1x32xf32>
    %5 = vector.broadcast %4 : vector<1x32xf32> to vector<64x32xf32>
    %6 = arith.subf %3, %5 : vector<64x32xf32>
    %c0_4 = arith.constant 0 : index
    %c0_5 = arith.constant 0 : index
    %7 = vector.load %arg4[%c0_4, %c0_5] : memref<64x1xi32, #tpu.memory_space<vmem>>, vector<64x1xi32>
    %8 = tpu.iota {dimensions = array<i32: 1>} : vector<64x4xi32>
    %9 = vector.broadcast %7 : vector<64x1xi32> to vector<64x4xi32>
    %10 = arith.cmpi eq, %9, %8 : vector<64x4xi32>
    %11 = arith.extui %10 : vector<64x4xi1> to vector<64x4xi32>
    %12 = arith.sitofp %11 : vector<64x4xi32> to vector<64x4xf32>
    %c0_6 = arith.constant 0 : index
    %c0_7 = arith.constant 0 : index
    %13 = vector.load %arg2[%c0_6, %c0_7] : memref<1x4xf32, #tpu.memory_space<vmem>>, vector<1x4xf32>
    %14 = vector.broadcast %13 : vector<1x4xf32> to vector<64x4xf32>
    %15 = arith.mulf %12, %14 : vector<64x4xf32>
    %cst = arith.constant dense<0.000000e+00> : vector<64xf32>
    %16 = vector.multi_reduction <add>, %15, %cst [1] : vector<64x4xf32> to vector<64xf32>
    %17 = vector.shape_cast %16 : vector<64xf32> to vector<64x1xf32>
    %18 = vector.broadcast %17 : vector<64x1xf32> to vector<64x32xf32>
    %19 = arith.mulf %6, %18 : vector<64x32xf32>
    %c0_8 = arith.constant 0 : index
    %c0_9 = arith.constant 0 : index
    %c0_10 = arith.constant 0 : index
    %20 = vector.load %arg7[%c0_8, %c0_9, %c0_10] : memref<1x32x32xf32, #tpu.memory_space<vmem>>, vector<1x32x32xf32>
    %21 = vector.shape_cast %20 : vector<1x32x32xf32> to vector<32x32xf32>
    %cst_11 = arith.constant dense<0.000000e+00> : vector<32x32xf32>
    %22 = tpu.matmul %6, %6, %cst_11 {dimension_numbers = #tpu.dot_dimension_numbers<[0], [0], [1], [1], [0, 1, 1, 1], [], []>} : vector<64x32xf32>, vector<64x32xf32>, vector<32x32xf32> -> vector<32x32xf32>
    %23 = arith.addf %21, %22 : vector<32x32xf32>
    %c0_12 = arith.constant 0 : index
    %c0_13 = arith.constant 0 : index
    %c0_14 = arith.constant 0 : index
    %24 = vector.load %arg7[%c0_12, %c0_13, %c0_14] : memref<1x32x32xf32, #tpu.memory_space<vmem>>, vector<1x32x32xf32>
    %25 = vector.shape_cast %24 : vector<1x32x32xf32> to vector<32x32xf32>
    %26 = vector.shape_cast %23 : vector<32x32xf32> to vector<1x32x32xf32>
    tpu.vector_store %arg7[%c0_12, %c0_13, %c0_14], %26 {strides = array<i32>} : memref<1x32x32xf32, #tpu.memory_space<vmem>>, vector<1x32x32xf32>,
    %c0_15 = arith.constant 0 : index
    %c0_16 = arith.constant 0 : index
    %c0_17 = arith.constant 0 : index
    %27 = vector.load %arg8[%c0_15, %c0_16, %c0_17] : memref<1x32x32xf32, #tpu.memory_space<vmem>>, vector<1x32x32xf32>
    %28 = vector.shape_cast %27 : vector<1x32x32xf32> to vector<32x32xf32>
    %cst_18 = arith.constant dense<0.000000e+00> : vector<32x32xf32>
    %29 = tpu.matmul %19, %6, %cst_18 {dimension_numbers = #tpu.dot_dimension_numbers<[0], [0], [1], [1], [0, 1, 1, 1], [], []>} : vector<64x32xf32>, vector<64x32xf32>, vector<32x32xf32> -> vector<32x32xf32>
    %30 = arith.addf %28, %29 : vector<32x32xf32>
    %c0_19 = arith.constant 0 : index
    %c0_20 = arith.constant 0 : index
    %c0_21 = arith.constant 0 : index
    %31 = vector.load %arg8[%c0_19, %c0_20, %c0_21] : memref<1x32x32xf32, #tpu.memory_space<vmem>>, vector<1x32x32xf32>
    %32 = vector.shape_cast %31 : vector<1x32x32xf32> to vector<32x32xf32>
    %33 = vector.shape_cast %30 : vector<32x32xf32> to vector<1x32x32xf32>
    tpu.vector_store %arg8[%c0_19, %c0_20, %c0_21], %33 {strides = array<i32>} : memref<1x32x32xf32, #tpu.memory_space<vmem>>, vector<1x32x32xf32>,
    %c0_22 = arith.constant 0 : index
    %c0_23 = arith.constant 0 : index
    %c0_24 = arith.constant 0 : index
    %34 = vector.load %arg6[%c0_22, %c0_23, %c0_24] : memref<1x4x32xf32, #tpu.memory_space<vmem>>, vector<1x4x32xf32>
    %35 = vector.shape_cast %34 : vector<1x4x32xf32> to vector<4x32xf32>
    %cst_25 = arith.constant dense<0.000000e+00> : vector<4x32xf32>
    %36 = tpu.matmul %12, %6, %cst_25 {dimension_numbers = #tpu.dot_dimension_numbers<[0], [0], [1], [1], [0, 1, 1, 1], [], []>} : vector<64x4xf32>, vector<64x32xf32>, vector<4x32xf32> -> vector<4x32xf32>
    %37 = arith.addf %35, %36 : vector<4x32xf32>
    %c0_26 = arith.constant 0 : index
    %c0_27 = arith.constant 0 : index
    %c0_28 = arith.constant 0 : index
    %38 = vector.load %arg6[%c0_26, %c0_27, %c0_28] : memref<1x4x32xf32, #tpu.memory_space<vmem>>, vector<1x4x32xf32>
    %39 = vector.shape_cast %38 : vector<1x4x32xf32> to vector<4x32xf32>
    %40 = vector.shape_cast %37 : vector<4x32xf32> to vector<1x4x32xf32>
    tpu.vector_store %arg6[%c0_26, %c0_27, %c0_28], %40 {strides = array<i32>} : memref<1x4x32xf32, #tpu.memory_space<vmem>>, vector<1x4x32xf32>,
    return
  }
  func.func @transform_0(%arg0: i32, %arg1: i32) -> (i32, i32) {
    %c0_i32 = arith.constant 0 : i32
    %c0_i32_0 = arith.constant 0 : i32
    %c0_i32_1 = arith.constant 0 : i32
    return %c0_i32, %c0_i32_0 : i32, i32
  }
  func.func @transform_1(%arg0: i32, %arg1: i32) -> (i32, i32) {
    %c0_i32 = arith.constant 0 : i32
    %c0_i32_0 = arith.constant 0 : i32
    %c0_i32_1 = arith.constant 0 : i32
    return %c0_i32, %c0_i32_0 : i32, i32
  }
  func.func @transform_2(%arg0: i32, %arg1: i32) -> (i32, i32) {
    %c2_i32 = arith.constant 2 : i32
    %0 = arith.muli %arg0, %c2_i32 : i32
    %1 = arith.addi %0, %arg1 : i32
    %c0_i32 = arith.constant 0 : i32
    %c0_i32_0 = arith.constant 0 : i32
    return %1, %c0_i32 : i32, i32
  }
  func.func @transform_3(%arg0: i32, %arg1: i32) -> (i32, i32) {
    %c2_i32 = arith.constant 2 : i32
    %0 = arith.muli %arg0, %c2_i32 : i32
    %1 = arith.addi %0, %arg1 : i32
    %c0_i32 = arith.constant 0 : i32
    %c0_i32_0 = arith.constant 0 : i32
    return %1, %c0_i32 : i32, i32
  }
  func.func @transform_4(%arg0: i32, %arg1: i32) -> (i32, i32, i32) {
    %c0_i32 = arith.constant 0 : i32
    %c0_i32_0 = arith.constant 0 : i32
    %c0_i32_1 = arith.constant 0 : i32
    return %arg0, %c0_i32, %c0_i32_0 : i32, i32, i32
  }
  func.func @transform_5(%arg0: i32, %arg1: i32) -> (i32, i32, i32) {
    %c0_i32 = arith.constant 0 : i32
    %c0_i32_0 = arith.constant 0 : i32
    %c0_i32_1 = arith.constant 0 : i32
    return %arg0, %c0_i32, %c0_i32_0 : i32, i32, i32
  }
  func.func @transform_6(%arg0: i32, %arg1: i32) -> (i32, i32, i32) {
    %c0_i32 = arith.constant 0 : i32
    %c0_i32_0 = arith.constant 0 : i32
    %c0_i32_1 = arith.constant 0 : i32
    return %arg0, %c0_i32, %c0_i32_0 : i32, i32, i32
  }
}

</mosaic_0001>

<bundles_post_ra>
// kernel: tpu_custom_call.1
= control target key start
LH: loop header
LB: loop body
LE: loop exit
PB: predicated region body
PF: predicated region fallthrough
CT: control target
= control target key end

     0   :  { %12 = vsyncpa [#allocation3], 0  ;;  %s1919_s0 = inlined_call_operand.vmem [shape: f32[1,4], index: 0, kind: input, shape index: {}]   ;;  %s1920_s1 = inlined_call_operand.vmem [shape: f32[1,32], index: 1, kind: input, shape index: {}]   ;;  %s1921_s2 = inlined_call_operand.vmem [shape: s32[256,1], index: 2, kind: input, shape index: {}]   ;;  %s1922_s3 = inlined_call_operand.vmem [shape: f32[256,32], index: 3, kind: input, shape index: {}]   ;;  %s1923_s4 = inlined_call_operand.hbm [shape: f32[2,4,32], index: 4, kind: output, shape index: {0}]   ;;  %s1924_s5 = inlined_call_operand.hbm [shape: f32[2,32,32], index: 5, kind: output, shape index: {1}]   ;;  %s1925_s6 = inlined_call_operand.hbm [shape: f32[2,32,32], index: 6, kind: output, shape index: {2}]  }
   0x1   :  { %14 = vsyncpa [#allocation3 + $0x1], 0 }
   0x2   :  { %15 = vsyncpa [#allocation5], 0 }
   0x3   :  { %17 = vsyncpa [#allocation5 + $0x1], 0  ;;  %s1497_s21 = smov 0   ;;  %s1499_s22 = smov 0  }
   0x4   :  { %s1501_s23 = smov 0   ;;  %s1503_s24 = smov 0  }
   0x5   :  { %s1505_s25 = smov 0   ;;  %s1507_s26 = smov 0  }
   0x6   :  { %s1509_s27 = smov 0   ;;  %s1511_s28 = smov 0  }
   0x7 LB: > { %1931 = sst [smem:[#allocation9_spill]] %s1443_s26  ;;  %s1927_s29 = sadd.s32 4294967295, %s1451_s28   ;;  %s1451_s28 = sphi %s1511_s28, %s23_s28   ;;  %s1447_s27 = sphi %s1509_s27, %s1944_s27   ;;  %s1443_s26 = sphi %s1507_s26, %s1943_s26   ;;  %s1439_s25 = sphi %s1505_s25, %s1942_s25   ;;  %s1435_s24 = sphi %s1503_s24, %s1941_s24   ;;  %s1431_s23 = sphi %s1501_s23, %s1947_s23   ;;  %s1427_s22 = sphi %s1499_s22, %s1946_s22   ;;  %s1423_s21 = sphi %s1497_s21, %s1945_s21  }
   0x8   : > { %1932 = sst [smem:[#allocation10_spill]] %s1447_s27  ;;  %s1926_s30 = sadd.s32 4294967294, %s1451_s28  }
   0x9   : > { %s32_s7 = sadd.s32 1, %s1443_s26  ;;  %s35_s8 = sadd.s32 1, %s1447_s27 }
   0xa   : > { %p33_p0 = scmp.ge.s32.totalorder %s32_s7, 2  ;;  %p154_p1 = scmp.ne.s32.totalorder %s1431_s23, %s1427_s22 }
   0xb   : > { %p155_p2 = scmp.eq.s32.totalorder %s1927_s29, 3  ;;  %p160_p4 = scmp.ne.s32.totalorder %s1427_s22, %s1423_s21 }
   0xc   : > { %s1949_s7 = smov (%p33_p0, %s32_s7), 0  ;;  %s1951_s8 = smov (!%p33_p0, %s35_s8), %s1447_s27 }
   0xd   : > { %1933 = sst [smem:[#allocation11_spill]] %s1949_s7  ;;  %p1548_p3 = por %p155_p2, %p154_p1 }
   0xe   : > { %p37_p5 = scmp.ge.s32.totalorder %s1951_s8, 2  ;;  %p161_p6 = scmp.eq.s32.totalorder %s1926_s30, 3 }
   0xf   : > { %p1076_p7 = scmp.ge.s32.totalorder %s1451_s28, 1  ;;  %p263_p8 = scmp.lt.s32.totalorder %s1451_s28, 5 }
  0x10   : > { %s1953_s8 = smov (%p37_p5, %s1951_s8), 0  ;;  %p1560_p9 = por %p161_p6, %p160_p4 }
  0x11   : > { %1935 = sst [smem:[#allocation12_spill]] %s1953_s8  ;;  %p264_p10 = pnand %p1076_p7, %p263_p8 }
  0x12   : > { %s141_s11 = ssub.s32 %s1447_s27, %s1953_s8  ;;  %s144_s12 = sadd.s32 1, %s1431_s23 }
  0x13   : > { %p142_p11 = scmp.eq.s32.totalorder %s141_s11, 0  ;;  %267 = sbr.rel (%p264_p10) target bundleno = 680 (0x2a8), region = 36 }
  0x14   : > { %s1571_s14 = sand.u32 (!%p264_p10), 1, %s1427_s22   ;;  %s1080_s15 = sshll.u32 (!%p264_p10), %s1439_s25, 1 }
  0x15   : > { %s1568_s13 = scalar_select %p142_p11, %s1431_s23, %s144_s12  }
  0x16   : > { %s1077_s16 = sshll.u32 (!%p264_p10), %s1571_s14, 2  ;;  %s1078_s17 = sshll.u32 (!%p264_p10), %s1571_s14, 5 }
  0x17   : > { %1937 = sst [smem:[#allocation13_spill]] %s1568_s13  ;;  %s313_s18 = sadd.s32 (!%p264_p10), %s1435_s24, %s1080_s15 }
  0x18   : > { %s1081_s19 = sshll.u32 %s313_s18, 3  ;;  %s1587_s27 = scalar_lea.vmem [#allocation2], %s1077_s16 }
  0x19   : > { %p315_p12 = scmp.lt.s32.totalorder %s1081_s19, 31  ;;  %s1589_s26 = scalar_lea.vmem [#allocation4], %s1078_s17 }
  0x1a   : > { %s1591_s13 = scalar_lea.vmem [#allocation6], %s1078_s17  ;;  %p1086_p13 = scmp.ne.s32.totalorder %s1435_s24, 0 }
  0x1b   : > { %s1955_s19 = smov (!%p315_p12, %s1081_s19), 31 }
  0x1c   : > { %s1082_s20 = sshll.u32 %s1955_s19, 3  ;;  %335 = sbr.rel (%p1086_p13) target bundleno = 39 (0x27), region = 40 }
  0x1d   : > { %s1580_s12 = scalar_lea.vmem %s1921_s2, %s1082_s20  ;;  %s1585_s7 = scalar_lea.vmem %s1922_s3, %s1082_s20 }
  0x21   : > { %vm336_vm0 = vcmask 257024   ;;  %vm338_vm1 = vcmask 261120   ;;  %v1453_v0 = vmov 0.0  }
  0x22   : > { %337 = vst.msk [vmem:[%s1587_s27] sm:$0xf] %vm336_vm0, %v1453_v0 }
  0x23   : > { %339 = vst.msk [vmem:[%s1589_s26] sm:$0xff] %vm338_vm1, %v1453_v0  ;;  %340 = vst.msk [vmem:[%s1589_s26 + $0x8] sm:$0xff] %vm338_vm1, %v1453_v0 }
  0x24   : > { %341 = vst.msk [vmem:[%s1589_s26 + $0x10] sm:$0xff] %vm338_vm1, %v1453_v0  ;;  %342 = vst.msk [vmem:[%s1589_s26 + $0x18] sm:$0xff] %vm338_vm1, %v1453_v0 }
  0x25   : > { %343 = vst.msk [vmem:[%s1591_s13] sm:$0xff] %vm338_vm1, %v1453_v0  ;;  %344 = vst.msk [vmem:[%s1591_s13 + $0x8] sm:$0xff] %vm338_vm1, %v1453_v0 }
  0x26   : > { %345 = vst.msk [vmem:[%s1591_s13 + $0x10] sm:$0xff] %vm338_vm1, %v1453_v0  ;;  %346 = vst.msk [vmem:[%s1591_s13 + $0x18] sm:$0xff] %vm338_vm1, %v1453_v0 }
  0x27 PF: > { %v372_v1 = vld [vmem:[%s1580_s12 + $0x10] sm:$0xff]  ;;  %v370_v2 = vld [vmem:[%s1580_s12] sm:$0xff]  ;;  %v1454_v3 = vmov 0   ;;  %v373_v4 = vld [vmem:[%s1580_s12 + $0x18] sm:$0xff]  ;;  %v378_v10 = vlaneseq  ;;  %v1455_v15 = vmov 0.0   ;;  %vm443_vm4 = vcmask 31744  }
  0x28   : > { %1302 = vset.pattern.permute.xlu1 %v1454_v3  ;;  %1301 = vset.pattern.permute.xlu0 %v1454_v3  ;;  %v371_v5 = vld [vmem:[%s1580_s12 + $0x8] sm:$0xff]  ;;  %v374_v7 = vld [vmem:[%s1580_s12 + $0x20] sm:$0xff]  ;;  %v377_v8 = vld [vmem:[%s1580_s12 + $0x38] sm:$0xff]  ;;  %vm512_vm11 = vcmask 523264   ;;  %vm1456_vm12 = vmmov 0   ;;  %vm614_vm13 = vcmask 261120  }
  0x29   : > { %387 = vperm.xlu1 %1302, %v372_v1   ;;  %381 = vperm.xlu0 %1301, %v370_v2   ;;  %v375_v6 = vld [vmem:[%s1580_s12 + $0x28] sm:$0xff]  ;;  %v376_v9 = vld [vmem:[%s1580_s12 + $0x30] sm:$0xff]  ;;  %v379_v11 = vand.u32 127, %v378_v10  ;;  %v1096_v14 = vld [vmem:[%s1919_s0] ss:$0 sm:$0xff]  ;;  %s1116_s16 = sshll.u32 %s1439_s25, 9 }
  0x2a   : > { %v1087_v46 = vld [vmem:[%s1920_s1] ss:$0 sm:$0xff]  ;;  %v353_v47 = vld [vmem:[%s1585_s7 + $0x30] sm:$0xff]  ;;  %v354_v48 = vld [vmem:[%s1585_s7 + $0x38] sm:$0xff]  ;;  %s906_s17 = sshll.u32 %s1589_s26, 4  ;;  %s1782_s20 = scalar_lea.hbm %s1924_s5, %s1116_s16  ;;  %s1786_s17 = int_to_ptr.vmem [resolvable:$true] %s906_s17 }
  0x2b   : > { %v1659_v49 = vsub.f32 %v354_v48, %v1087_v46  ;;  %v352_v50 = vld [vmem:[%s1585_s7 + $0x28] sm:$0xff]  ;;  %v1662_v51 = vsub.f32 %v353_v47, %v1087_v46  ;;  %v351_v52 = vld [vmem:[%s1585_s7 + $0x20] sm:$0xff]  ;;  %v350_v54 = vld [vmem:[%s1585_s7 + $0x18] sm:$0xff]  ;;  %s1303_s12 = scalar_lea.vmem %s1786_s17, 512  ;;  %s1457_s24 = smov [#allocation4]  }
  0x2c   : > { %v1669_v53 = vsub.f32 %v352_v50, %v1087_v46  ;;  %v1676_v55 = vsub.f32 %v351_v52, %v1087_v46  ;;  %v349_v56 = vld [vmem:[%s1585_s7 + $0x10] sm:$0xff]  ;;  %v1683_v57 = vsub.f32 %v350_v54, %v1087_v46  ;;  %v348_v58 = vld [vmem:[%s1585_s7 + $0x8] sm:$0xff]  ;;  %v347_v60 = vld [vmem:[%s1585_s7] sm:$0xff]  ;;  %s1938_s7 = sadd.s32 4294967295, %s1451_s28   ;;  %p1304_p0 = scmp.ne.s32.totalorder %s1786_s17, %s1303_s12 }
  0x2d   : > { %390 = vperm.xlu1 %1302, %v373_v4   ;;  %384 = vperm.xlu0 %1301, %v371_v5   ;;  %v1690_v59 = vsub.f32 %v349_v56, %v1087_v46  ;;  %v1697_v61 = vsub.f32 %v348_v58, %v1087_v46  ;;  %v1703_v62 = vsub.f32 %v347_v60, %v1087_v46  ;;  %s1772_s15 = sand.u32 1, %s1938_s7   ;;  %s1307_s29 = sshll.u32 %s1457_s24, 4  ;;  %s1308_s29 = int_to_ptr.vmem [resolvable:$false] %s1307_s29 }
  0x2e   : > { %1151 = vmatprep.subr.mxu0 %v1659_v49  ;;  %1173 = vmatprep.subr.mxu1 %v1659_v49  ;;  %s875_s11 = scalar_lea.sflag [#allocation5], %s1772_s15  ;;  %p1305_p1 = pnand %p1304_p0, %p1548_p3 }
  0x2f   : > { %1152 = vmatpush3.msra.mxu0 %v1659_v49  ;;  %1174 = vmatpush3.msra.mxu1 %v1659_v49  ;;  %s1309_s30 = scalar_lea.vmem %s1308_s29, 1024  ;;  %p1310_p4 = scmp.lt.s32.totalorder %s1786_s17, %s1308_s29 }
  0x30   : > { %1153 = vmatprep.subr.mxu0 %v1662_v51  ;;  %1175 = vmatprep.subr.mxu1 %v1662_v51  ;;  %p1306_p2 = pneg %p1305_p1  ;;  %p1311_p5 = scmp.lt.s32.totalorder %s1309_s30, %s1303_s12 }
  0x31   : > { %396 = vperm.xlu1 %1302, %v375_v6   ;;  %393 = vperm.xlu0 %1301, %v374_v7  }
  0x32   : > { %1154 = vmatpush3.msra.mxu0 %v1662_v51  ;;  %1176 = vmatpush3.msra.mxu1 %v1662_v51  ;;  %p1312_p6 = por %p1311_p5, %p1310_p4 }
  0x33   : > { %1155 = vmatprep.subr.mxu0 %v1669_v53  ;;  %1177 = vmatprep.subr.mxu1 %v1669_v53 }
  0x34   : > { %1156 = vmatpush3.msra.mxu0 %v1669_v53  ;;  %1178 = vmatpush3.msra.mxu1 %v1669_v53  ;;  %p1313_p7 = pnand %p1312_p6, %p1306_p2 }
  0x35   : > { %402 = vperm.xlu1 %1302, %v377_v8   ;;  %399 = vperm.xlu0 %1301, %v376_v9  }
  0x36   : > { %1157 = vmatprep.subr.mxu0 %v1676_v55  ;;  %1179 = vmatprep.subr.mxu1 %v1676_v55 }
  0x37   : > { %1158 = vmatpush3.msra.mxu0 %v1676_v55  ;;  %1180 = vmatpush3.msra.mxu1 %v1676_v55 }
  0x38   : > { %1159 = vmatprep.subr.mxu0 %v1683_v57  ;;  %1181 = vmatprep.subr.mxu1 %v1683_v57 }
  0x39   : > { %1160 = vmatpush3.msra.mxu0 %v1683_v57  ;;  %1182 = vmatpush3.msra.mxu1 %v1683_v57 }
  0x3a   : > { %1161 = vmatprep.subr.mxu0 %v1690_v59  ;;  %1183 = vmatprep.subr.mxu1 %v1690_v59 }
  0x3b   : > { %1162 = vmatpush3.msra.mxu0 %v1690_v59  ;;  %1184 = vmatpush3.msra.mxu1 %v1690_v59 }
  0x3c   : > { %1163 = vmatprep.subr.mxu0 %v1697_v61  ;;  %1185 = vmatprep.subr.mxu1 %v1697_v61 }
  0x3d   : > { %1164 = vmatpush3.msra.mxu0 %v1697_v61  ;;  %1186 = vmatpush3.msra.mxu1 %v1697_v61 }
  0x3e   : > { %1165 = vmatprep.subr.mxu0 %v1703_v62  ;;  %1187 = vmatprep.subr.mxu1 %v1703_v62 }
  0x3f   : > { %1166 = vmatpush3.msra.mxu0 %v1703_v62  ;;  %1188 = vmatpush3.msra.mxu1 %v1703_v62 }
  0x40   : > { %1195 = vmatprep.subr.mxu0 %v1455_v15 }
  0xa4   : > { %v388_v12 = vpop.permute.xlu1 %387  ;;  %v382_v13 = vpop.permute.xlu0 %381 }
  0xa5   : > { %vm406_vm2 = vcmp.eq.s32.totalorder %v388_v12, %v379_v11  ;;  %vm404_vm3 = vcmp.eq.s32.totalorder %v382_v13, %v379_v11 }
  0xa6   : > { %v1615_v16 = vsel %vm406_vm2, 1.0, %v1455_v15  ;;  %v1618_v17 = vsel %vm404_vm3, 1.0, %v1455_v15 }
  0xa7   : > { %v435_v18 = vmul.f32 %v1096_v14, %v1618_v17  ;;  %v437_v19 = vmul.f32 %v1096_v14, %v1615_v16 }
  0xa8   : > { %v391_v20 = vpop.permute.xlu1 %390  ;;  %v385_v21 = vpop.permute.xlu0 %384 }
  0xa9   : > { %vm407_vm5 = vcmp.eq.s32.totalorder %v391_v20, %v379_v11  ;;  %vm405_vm6 = vcmp.eq.s32.totalorder %v385_v21, %v379_v11  ;;  %v444_v22 = vsel %vm443_vm4, %v435_v18, 0.0  ;;  %v450_v25 = vsel %vm443_vm4, %v437_v19, 0.0 }
  0xaa   : > { %v1624_v23 = vsel %vm407_vm5, 1.0, %v1455_v15  ;;  %v1627_v24 = vsel %vm405_vm6, 1.0, %v1455_v15  ;;  %445 = vadd.xlane.f32.xlu0 %v444_v22 }
  0xab   : > { %v436_v26 = vmul.f32 %v1096_v14, %v1627_v24  ;;  %v438_v27 = vmul.f32 %v1096_v14, %v1624_v23 }
  0xac   : > { %v397_v28 = vpop.permute.xlu1 %396  ;;  %v394_v29 = vpop.permute.xlu0 %393 }
  0xad   : > { %vm409_vm7 = vcmp.eq.s32.totalorder %v397_v28, %v379_v11  ;;  %vm408_vm8 = vcmp.eq.s32.totalorder %v394_v29, %v379_v11  ;;  %v447_v30 = vsel %vm443_vm4, %v436_v26, 0.0  ;;  %v453_v33 = vsel %vm443_vm4, %v438_v27, 0.0  ;;  %v476_v26 = vld [vmem:[%s1589_s26] sm:$0xff] }
  0xae   : > { %v1634_v31 = vsel %vm409_vm7, 1.0, %v1455_v15  ;;  %v1637_v32 = vsel %vm408_vm8, 1.0, %v1455_v15  ;;  %451 = vadd.xlane.f32.xlu0 %v450_v25  ;;  %448 = vadd.xlane.f32.xlu1 %v447_v30  ;;  %v479_v30 = vld [vmem:[%s1589_s26 + $0x18] sm:$0xff] }
  0xaf   : > { %v439_v34 = vmul.f32 %v1096_v14, %v1637_v32  ;;  %v440_v38 = vmul.f32 %v1096_v14, %v1634_v31 }
  0xb0   : > { %v403_v35 = vpop.permute.xlu1 %402  ;;  %v400_v36 = vpop.permute.xlu0 %399 }
  0xb1   : > { %vm411_vm9 = vcmp.eq.s32.totalorder %v403_v35, %v379_v11  ;;  %vm410_vm10 = vcmp.eq.s32.totalorder %v400_v36, %v379_v11  ;;  %v456_v37 = vsel %vm443_vm4, %v439_v34, 0.0  ;;  %v459_v42 = vsel %vm443_vm4, %v440_v38, 0.0 }
  0xb2   : > { %v1644_v39 = vsel %vm411_vm9, 1.0, %v1455_v15  ;;  %v1647_v40 = vsel %vm410_vm10, 1.0, %v1455_v15  ;;  %454 = vadd.xlane.f32.xlu0 %v453_v33  ;;  %457 = vadd.xlane.f32.xlu1 %v456_v37 }
  0xb3   : > { %v441_v41 = vmul.f32 %v1096_v14, %v1647_v40  ;;  %v442_v44 = vmul.f32 %v1096_v14, %v1644_v39 }
  0xb5   : > { %v462_v43 = vsel %vm443_vm4, %v441_v41, 0.0  ;;  %v465_v45 = vsel %vm443_vm4, %v442_v44, 0.0 }
  0xb6   : > { %460 = vadd.xlane.f32.xlu0 %v459_v42  ;;  %463 = vadd.xlane.f32.xlu1 %v462_v43 }
  0xba   : > { %466 = vadd.xlane.f32.xlu0 %v465_v45 }
  0xe9   : > { %480 = vxpose.xlu1.b32.start [1/8] (short) (narrow) %v1703_v62, 32 }
  0xed   : > { %481 = vxpose.xlu1.b32.cont [2/8] (short) (narrow) %v1697_v61, 32 }
  0xf1   : > { %482 = vxpose.xlu1.b32.cont [3/8] (short) (narrow) %v1690_v59, 32 }
  0xf5   : > { %483 = vxpose.xlu1.b32.cont [4/8] (short) (narrow) %v1683_v57, 32 }
  0xf9   : > { %484 = vxpose.xlu1.b32.cont [5/8] (short) (narrow) %v1676_v55, 32 }
  0xfd   : > { %485 = vxpose.xlu1.b32.cont [6/8] (short) (narrow) %v1669_v53, 32 }
 0x101   : > { %486 = vxpose.xlu1.b32.cont [7/8] (short) (narrow) %v1662_v51, 32 }
 0x105   : > { %487 = vxpose.xlu1.b32.end [8/8] (short) (narrow) %v1659_v49, 32 }
 0x133   : > { %v446_v63 = vpop.xlane.xlu0 %445 }
 0x134   : > { %v468_v0 = vmul.f32 %v446_v63, %v1703_v62 }
 0x136   : > { %623 = vxpose.xlu0.b32.start [1/8] (short) (narrow) %v468_v0, 32 }
 0x137   : > { %v449_v1 = vpop.xlane.xlu1 %448  ;;  %v452_v2 = vpop.xlane.xlu0 %451 }
 0x138   : > { %v469_v3 = vmul.f32 %v449_v1, %v1697_v61  ;;  %v470_v4 = vmul.f32 %v452_v2, %v1690_v59 }
 0x13a   : > { %624 = vxpose.xlu0.b32.cont [2/8] (short) (narrow) %v469_v3, 32 }
 0x13b   : > { %v455_v5 = vpop.xlane.xlu0 %454  ;;  %v458_v7 = vpop.xlane.xlu1 %457 }
 0x13c   : > { %v471_v6 = vmul.f32 %v455_v5, %v1683_v57  ;;  %v472_v8 = vmul.f32 %v458_v7, %v1676_v55 }
 0x13e   : > { %625 = vxpose.xlu0.b32.cont [3/8] (short) (narrow) %v470_v4, 32 }
 0x13f   : > { %v461_v9 = vpop.xlane.xlu0 %460  ;;  %v464_v11 = vpop.xlane.xlu1 %463 }
 0x140   : > { %v473_v10 = vmul.f32 %v461_v9, %v1669_v53  ;;  %v474_v12 = vmul.f32 %v464_v11, %v1662_v51 }
 0x142   : > { %626 = vxpose.xlu0.b32.cont [4/8] (short) (narrow) %v471_v6, 32 }
 0x143   : > { %v467_v13 = vpop.xlane.xlu0 %466 }
 0x144   : > { %v475_v14 = vmul.f32 %v467_v13, %v1659_v49 }
 0x146   : > { %627 = vxpose.xlu0.b32.cont [5/8] (short) (narrow) %v472_v8, 32 }
 0x14a   : > { %628 = vxpose.xlu0.b32.cont [6/8] (short) (narrow) %v473_v10, 32 }
 0x14e   : > { %629 = vxpose.xlu0.b32.cont [7/8] (short) (narrow) %v474_v12, 32 }
 0x152   : > { %630 = vxpose.xlu0.b32.end [8/8] (short) (narrow) %v475_v14, 32 }
 0x156   : > { %761 = vxpose.xlu0.b32.start [1/8] (short) (narrow) %v1618_v17, 8 }
 0x15a   : > { %762 = vxpose.xlu0.b32.cont [2/8] (short) (narrow) %v1627_v24, 8  ;;  %v477_v24 = vld [vmem:[%s1589_s26 + $0x8] sm:$0xff] }
 0x15e   : > { %763 = vxpose.xlu0.b32.cont [3/8] (short) (narrow) %v1615_v16, 8 }
 0x162   : > { %764 = vxpose.xlu0.b32.cont [4/8] (short) (narrow) %v1624_v23, 8 }
 0x165   : > { %v496_v18 = vpop.trf.xlu1 }
 0x166   : > { %765 = vxpose.xlu0.b32.cont [5/8] (short) (narrow) %v1637_v32, 8  ;;  %1167 = vmatprep.mubr.msk.f32.mxu0 %vm512_vm11, %v496_v18  ;;  %v478_v32 = vld [vmem:[%s1589_s26 + $0x10] sm:$0xff] }
 0x169   : > { %v497_v19 = vpop.trf.xlu1 }
 0x16a   : > { %766 = vxpose.xlu0.b32.cont [6/8] (short) (narrow) %v1634_v31, 8  ;;  %1168 = vmatmul.mubr.msk.f32.vlgmr.msra.gmra.mxu0 %vm512_vm11, %v497_v19 }
 0x16b   : > { %1196 = vmatpush3.msra.mxu0 %v1659_v49 }
 0x16c   : > { %1197 = vmatprep.subr.mxu0 %v1455_v15 }
 0x16d   : > { %1198 = vmatpush3.msra.mxu0 %v1662_v51  ;;  %v498_v16 = vpop.trf.xlu1 }
 0x16e   : > { %767 = vxpose.xlu0.b32.cont [7/8] (short) (narrow) %v1647_v40, 8  ;;  %1199 = vmatprep.subr.mxu0 %v1455_v15 }
 0x16f   : > { %1200 = vmatpush3.msra.mxu0 %v1669_v53  ;;  %1170 = vmatprep.mubr.msk.f32.mxu0 %vm512_vm11, %v498_v16 }
 0x170   : > { %1201 = vmatprep.subr.mxu0 %v1455_v15 }
 0x171   : > { %1202 = vmatpush3.msra.mxu0 %v1676_v55  ;;  %v499_v17 = vpop.trf.xlu1 }
 0x172   : > { %768 = vxpose.xlu0.b32.end [8/8] (short) (narrow) %v1644_v39, 8  ;;  %1203 = vmatprep.subr.mxu0 %v1455_v15 }
 0x173   : > { %1204 = vmatpush3.msra.mxu0 %v1683_v57 }
 0x174   : > { %1171 = vmatmul.mubr.msk.f32.gmra.mxu0 %vm512_vm11, %v499_v17  ;;  %1205 = vmatprep.subr.mxu0 %v1455_v15 }
 0x175   : > { %1206 = vmatpush3.msra.mxu0 %v1690_v59  ;;  %1211 = vmatprep.mubr.msk.f32.mxu0 %vm1456_vm12, %v1455_v15 }
 0x176   : > { %1207 = vmatprep.subr.mxu0 %v1455_v15 }
 0x177   : > { %1208 = vmatpush3.msra.mxu0 %v1697_v61 }
 0x178   : > { %1209 = vmatprep.subr.mxu0 %v1455_v15 }
 0x179   : > { %1210 = vmatpush3.msra.mxu0 %v1703_v62 }
 0x1b2   : > { %v639_v20 = vpop.trf.xlu0 }
 0x1b3   : > { %1189 = vmatprep.mubr.msk.f32.mxu1 %vm512_vm11, %v639_v20 }
 0x1b6   : > { %v640_v21 = vpop.trf.xlu0 }
 0x1b7   : > { %1190 = vmatmul.mubr.msk.f32.vlgmr.msra.gmra.mxu1 %vm512_vm11, %v640_v21 }
 0x1ba   : > { %v641_v22 = vpop.trf.xlu0 }
 0x1bb   : > { %1192 = vmatprep.mubr.msk.f32.mxu1 %vm512_vm11, %v641_v22 }
 0x1be   : > { %v642_v23 = vpop.trf.xlu0 }
 0x1bf   : > { %1193 = vmatmul.mubr.msk.f32.gmra.mxu1 %vm512_vm11, %v642_v23 }
 0x1d2   : > { %v777_v15 = vpop.trf.xlu0 }
 0x1d3   : > { %1212 = vmatmul.mubr.msk.f32.vlgmr.msra.gmra.mxu0 %vm512_vm11, %v777_v15 }
 0x22a   : > { %v1169_v25 = vpop.f32.mrf.mxu0 }
 0x22b   : > { %v611_v27 = vadd.f32 %v1169_v25, %v477_v24 }
 0x22c   : > { %v591_v28 = vpop.f32.mrf.mxu0 }
 0x22d   : > { %616 = vst.msk [vmem:[%s1589_s26 + $0x8] sm:$0xff] %vm614_vm13, %v611_v27  ;;  %v610_v29 = vadd.f32 %v591_v28, %v476_v26 }
 0x22f   : > { %615 = vst.msk [vmem:[%s1589_s26] sm:$0xff] %vm614_vm13, %v610_v29 }
 0x234   : > { %v1172_v31 = vpop.f32.mrf.mxu0 }
 0x235   : > { %v613_v33 = vadd.f32 %v1172_v31, %v479_v30 }
 0x236   : > { %v601_v34 = vpop.f32.mrf.mxu0 }
 0x237   : > { %618 = vst.msk [vmem:[%s1589_s26 + $0x18] sm:$0xff] %vm614_vm13, %v613_v33  ;;  %v612_v35 = vadd.f32 %v601_v34, %v478_v32 }
 0x239   : > { %617 = vst.msk [vmem:[%s1589_s26 + $0x10] sm:$0xff] %vm614_vm13, %v612_v35 }
 0x23a   : > { %1316 = shalt.err (!%p1313_p7)
}
 0x23b   : > { %s1317_s26 = scalar_lea.hbm %s1782_s20, 512  ;;  %s1321_s18 = scalar_lea.hbm %s1924_s5, 1024 }
 0x23c   : > { %p1318_p8 = scmp.ne.s32.totalorder %s1782_s20, %s1317_s26  ;;  %p1322_p12 = scmp.lt.s32.totalorder %s1782_s20, %s1924_s5 }
 0x23d   : > { %p1323_p13 = scmp.lt.s32.totalorder %s1321_s18, %s1317_s26 }
 0x23e   : > { %p1319_p10 = pnand %p1318_p8, %p1548_p3 }
 0x23f   : > { %p1324_p0 = por %p1323_p13, %p1322_p12 }
 0x240   : > { %p1320_p11 = pneg %p1319_p10 }
 0x242   : > { %p1325_p1 = pnand %p1324_p0, %p1320_p11 }
 0x244   : > { %1328 = shalt.err (!%p1325_p1)
}
 0x245   : > { %s1458_s12 = smov 128   ;;  %s1459_s29 = smov 8   ;;  %v620_v36 = vld [vmem:[%s1591_s13 + $0x8] sm:$0xff]  ;;  %v619_v38 = vld [vmem:[%s1591_s13] sm:$0xff]  ;;  %v622_v42 = vld [vmem:[%s1591_s13 + $0x18] sm:$0xff] }
 0x246   : > { %1215 = dma.vmem_to_hbm [thread:$0]  (%p1548_p3), %s1786_s17, 512, %s1782_s20, %s875_s11, %s1458_s12, %s1458_s12, %s1459_s29  }
 0x247   : > { %v621_v44 = vld [vmem:[%s1591_s13 + $0x10] sm:$0xff]  ;;  %s922_s30 = sshll.u32 %s1591_s13, 4  ;;  %s1832_s26 = scalar_lea.hbm %s1925_s6, %s1116_s16  ;;  %s1834_s30 = int_to_ptr.vmem [resolvable:$true] %s922_s30 }
 0x248   : > { %s1329_s8 = scalar_lea.vmem %s1834_s30, 512  ;;  %s1460_s7 = smov [#allocation6]  }
 0x249   : > { %p1330_p2 = scmp.ne.s32.totalorder %s1834_s30, %s1329_s8  ;;  %s1333_s18 = sshll.u32 %s1460_s7, 4  ;;  %s1334_s18 = int_to_ptr.vmem [resolvable:$false] %s1333_s18 }
 0x24a   : > { %s1335_s19 = scalar_lea.vmem %s1334_s18, 1024  ;;  %p1336_p6 = scmp.lt.s32.totalorder %s1834_s30, %s1334_s18 }
 0x24b   : > { %p1331_p4 = pnand %p1330_p2, %p1548_p3  ;;  %p1337_p7 = scmp.lt.s32.totalorder %s1335_s19, %s1329_s8 }
 0x24d   : > { %p1332_p5 = pneg %p1331_p4  ;;  %p1338_p8 = por %p1337_p7, %p1336_p6 }
 0x24f   : > { %p1339_p10 = pnand %p1338_p8, %p1332_p5 }
 0x277   : > { %v1191_v37 = vpop.f32.mrf.mxu1 }
 0x278   : > { %v753_v39 = vadd.f32 %v1191_v37, %v620_v36 }
 0x279   : > { %v733_v40 = vpop.f32.mrf.mxu1 }
 0x27a   : > { %757 = vst.msk [vmem:[%s1591_s13 + $0x8] sm:$0xff] %vm614_vm13, %v753_v39  ;;  %v752_v41 = vadd.f32 %v733_v40, %v619_v38 }
 0x27c   : > { %756 = vst.msk [vmem:[%s1591_s13] sm:$0xff] %vm614_vm13, %v752_v41 }
 0x27f   : > { %v1194_v43 = vpop.f32.mrf.mxu1 }
 0x280   : > { %v755_v45 = vadd.f32 %v1194_v43, %v622_v42 }
 0x281   : > { %v743_v46 = vpop.f32.mrf.mxu1 }
 0x282   : > { %759 = vst.msk [vmem:[%s1591_s13 + $0x18] sm:$0xff] %vm614_vm13, %v755_v45  ;;  %v754_v47 = vadd.f32 %v743_v46, %v621_v44 }
 0x284   : > { %758 = vst.msk [vmem:[%s1591_s13 + $0x10] sm:$0xff] %vm614_vm13, %v754_v47 }
 0x285   : > { %1342 = shalt.err (!%p1339_p10)
}
 0x286   : > { %s1343_s16 = scalar_lea.hbm %s1832_s26, 512  ;;  %s1347_s17 = scalar_lea.hbm %s1925_s6, 1024 }
 0x287   : > { %p1344_p11 = scmp.ne.s32.totalorder %s1832_s26, %s1343_s16  ;;  %p1348_p0 = scmp.lt.s32.totalorder %s1832_s26, %s1925_s6 }
 0x288   : > { %p1349_p1 = scmp.lt.s32.totalorder %s1347_s17, %s1343_s16 }
 0x289   : > { %p1345_p12 = pnand %p1344_p11, %p1548_p3 }
 0x28a   : > { %p1350_p2 = por %p1349_p1, %p1348_p0 }
 0x28b   : > { %p1346_p13 = pneg %p1345_p12 }
 0x28d   : > { %p1351_p4 = pnand %p1350_p2, %p1346_p13 }
 0x28f   : > { %1354 = shalt.err (!%p1351_p4)
}
 0x290   : > { %1216 = dma.vmem_to_hbm [thread:$0]  (%p1548_p3), %s1834_s30, 512, %s1832_s26, %s875_s11, %s1458_s12, %s1458_s12, %s1459_s29   ;;  %vm867_vm14 = vcmask 257024  }
 0x291   : > { %v760_v48 = vld [vmem:[%s1587_s27] sm:$0xf]  ;;  %s1109_s8 = sshll.u32 %s1439_s25, 6  ;;  %s893_s18 = sshll.u32 %s1587_s27, 4  ;;  %s894_s18 = int_to_ptr.vmem [resolvable:$true] %s893_s18 }
 0x292   : > { %s1869_s13 = scalar_lea.hbm %s1923_s4, %s1109_s8  ;;  %s870_s15 = scalar_lea.sflag [#allocation3], %s1571_s14 }
 0x293   : > { %v862_v49 = vpop.f32.mrf.mxu0  ;;  %s1355_s24 = scalar_lea.vmem %s894_s18, 64  ;;  %s1461_s11 = smov [#allocation2]  }
 0x294   : > { %v866_v50 = vadd.f32 %v862_v49, %v760_v48  ;;  %p1356_p5 = scmp.ne.s32.totalorder %s894_s18, %s1355_s24  ;;  %s1359_s25 = sshll.u32 %s1461_s11, 4  ;;  %s1360_s25 = int_to_ptr.vmem [resolvable:$false] %s1359_s25 }
 0x295   : > { %v1213_v51 = vpop.f32.mrf.mxu0  ;;  %s1361_s12 = scalar_lea.vmem %s1360_s25, 128  ;;  %p1362_p8 = scmp.lt.s32.totalorder %s894_s18, %s1360_s25 }
 0x296   : > { %868 = vst.msk [vmem:[%s1587_s27] sm:$0xf] %vm867_vm14, %v866_v50  ;;  %p1357_p6 = pnand %p1356_p5, %p1548_p3  ;;  %p1363_p10 = scmp.lt.s32.totalorder %s1361_s12, %s1355_s24 }
 0x298   : > { %p1358_p7 = pneg %p1357_p6  ;;  %p1364_p11 = por %p1363_p10, %p1362_p8 }
 0x29a   : > { %p1365_p12 = pnand %p1364_p11, %p1358_p7 }
 0x29c   : > { %1368 = shalt.err (!%p1365_p12)
}
 0x29d   : > { %s1369_s27 = scalar_lea.hbm %s1869_s13, 64  ;;  %s1373_s30 = scalar_lea.hbm %s1923_s4, 128 }
 0x29e   : > { %p1370_p13 = scmp.ne.s32.totalorder %s1869_s13, %s1369_s27  ;;  %p1374_p2 = scmp.lt.s32.totalorder %s1869_s13, %s1923_s4 }
 0x29f   : > { %p1375_p4 = scmp.lt.s32.totalorder %s1373_s30, %s1369_s27 }
 0x2a0   : > { %p1371_p0 = pnand %p1370_p13, %p1548_p3 }
 0x2a1   : > { %p1376_p5 = por %p1375_p4, %p1374_p2 }
 0x2a2   : > { %p1372_p1 = pneg %p1371_p0 }
 0x2a4   : > { %p1377_p6 = pnand %p1376_p5, %p1372_p1 }
 0x2a6   : > { %1380 = shalt.err (!%p1377_p6)
}
 0x2a7   : > { %1214 = dma.vmem_to_hbm [thread:$0]  (%p1548_p3), %s894_s18, 64, %s1869_s13, %s870_s15  }
 0x2a8 PF: > { %p1230_p7 = scmp.ge.s32.totalorder %s1451_s28, 2  ;;  %s937_s20 = sand.u32 1, %s1423_s21  }
 0x2a9   : > { %s938_s7 = scalar_lea.sflag [#allocation3], %s937_s20 }
 0x2aa   : > { %p1221_p8 = pnand %p1230_p7, %p1560_p9 }
 0x2ac   : > { %p1222_p10 = pneg %p1221_p8 }
 0x2ae   : > { %1414 = dma.done.wait (%p1222_p10), %s938_s7, 64  }
 0x2af   : > { %1416 = vsyncadd (%p1222_p10), %s938_s7, 4294967232  ;;  %s1939_s8 = sadd.s32 4294967294, %s1451_s28  }
 0x2b0   : > { %s946_s19 = sand.u32 1, %s1939_s8  }
 0x2b1   : > { %s947_s16 = scalar_lea.sflag [#allocation5], %s946_s19 }
 0x2b2   : > { %1418 = dma.done.wait (%p1222_p10), %s947_s16, 1024  }
 0x2b3   : > { %1420 = vsyncadd (%p1222_p10), %s947_s16, 4294966272  ;;  %s23_s28 = sadd.s32 1, %s1451_s28   ;;  %s1940_s9 = sld [smem:[#allocation13_spill]] }
 0x2b4   : > { %p20_p3 = scmp.ge.s32.totalorder %s23_s28, 6   ;;  %s1941_s24 = sld [smem:[#allocation9_spill]] }
 0x2b5   : > { %s1942_s25 = sld [smem:[#allocation10_spill]]  ;;  %s1945_s21 = smov %s1427_s22 }
 0x2b6   : > { %s1943_s26 = sld [smem:[#allocation11_spill]]  ;;  %s1946_s22 = smov %s1431_s23 }
 0x2b7   : > { %s1944_s27 = sld [smem:[#allocation12_spill]]  ;;  %22 = sbr.rel (!%p20_p3) target bundleno = 7 (0x7), region = 110 }
 0x2b9   : > { %s1947_s23 = smov %s1940_s9 }
 0x2bc   :  { %961 = vsyncpa [#allocation3], 1 }
 0x2bd   :  { %963 = vsyncpa [#allocation3 + $0x1], 1 }
 0x2be   :  { %964 = vsyncpa [#allocation5], 1 }
 0x2bf   :  { %966 = vsyncpa [#allocation5 + $0x1], 1 }

</bundles_post_ra>
